<compile_context>
chip_gen: v6e
topology: v6e:2x2x1
jax: 0.10.0
libtpu: 0.0.40
codegen_flags: <defaults>
</compile_context>

<pallas_src>
import functools
import math

import jax
import jax.numpy as jnp
from jax.experimental import pallas as pl
from jax.experimental.pallas import tpu as pltpu


# ----------------------------------------------------------------------------
# Hardware / tiling helpers
# ----------------------------------------------------------------------------
def _round_up(x, m):
    return ((x + m - 1) // m) * m


@functools.lru_cache(maxsize=None)
def _tpu_vmem_capacity():
    try:
        return int(pltpu.get_tpu_info().vmem_capacity_bytes)
    except Exception:
        return 0


def _vmem_limit_bytes():
    cap = _tpu_vmem_capacity()
    if cap <= 0:
        return 48 * 1024 * 1024
    return int(min(cap * 0.8, 100 * 1024 * 1024))


def _mosaic_params(*semantics):
    return pltpu.CompilerParams(dimension_semantics=semantics,
                                vmem_limit_bytes=_vmem_limit_bytes())


@functools.lru_cache(maxsize=None)
def _buffered1_supported():
    """Probe whether pipeline_mode=pl.Buffered(1) compiles/runs here.
    Constant-index blocks are DMA'd once but get 2 buffers by default;
    single-buffering them halves their VMEM footprint (matters on v7x)."""
    if not hasattr(pl, "Buffered"):
        return False

    def _k(a_ref, c_ref, o_ref):
        o_ref[...] = a_ref[...] + c_ref[...]

    try:
        x = jnp.zeros((16, 128), jnp.float32)
        c = jnp.ones((8, 128), jnp.float32)
        f = pl.pallas_call(
            _k,
            out_shape=jax.ShapeDtypeStruct((16, 128), jnp.float32),
            grid=(2,),
            in_specs=[pl.BlockSpec((8, 128), lambda i: (i, 0)),
                      pl.BlockSpec((8, 128), lambda i: (0, 0),
                                   pipeline_mode=pl.Buffered(1))],
            out_specs=pl.BlockSpec((8, 128), lambda i: (i, 0)))
        jax.block_until_ready(f(x, c))
        return True
    except Exception:
        return False


def _const_spec(shape):
    """BlockSpec for an operand whose block is identical at every grid point
    (weights / biases / LN params): constant index_map, single-buffered when
    supported."""
    index_map = lambda *_: (0,) * len(shape)
    if _buffered1_supported():
        return pl.BlockSpec(shape, index_map, pipeline_mode=pl.Buffered(1))
    return pl.BlockSpec(shape, index_map)


def _row_tile(n, target):
    """Token-row tile: multiple of 8, <= target, prefers exact divisors."""
    if n <= target:
        return _round_up(n, 8)
    for cand in range(target, 127, -8):
        if n % cand == 0:
            return cand
    return target


def _attn_tiles(S):
    """(tq, tk, S_pad) for the attention grid.  Tiles are multiples of 128
    (lane constraint on the transposed-K block); S pads up to max(tq, tk)."""
    big_vmem = _tpu_vmem_capacity() >= 96 * 1024 * 1024
    if S <= 128:
        tq = tk = 128
    elif S < 2048 or not big_vmem:        # v7x (64 MiB) stays at 256
        tq = tk = 256
    else:                                 # v5e / v6e with long sequences
        tq, tk = 256, 512
    return tq, tk, _round_up(S, max(tq, tk))


def _layernorm(x, g, b, eps):
    mu = jnp.mean(x, axis=-1, keepdims=True)
    xc = x - mu
    var = jnp.mean(xc * xc, axis=-1, keepdims=True)
    return xc * jax.lax.rsqrt(var + eps) * g + b


def _bf16(a):
    return a.astype(jnp.bfloat16)


# ----------------------------------------------------------------------------
# Kernel 1: (optionally LayerNorm-fused) linear  y = [LN](x) @ W + b
#   pre-process 1x1 conv, post-process 1x1 conv (final LN fused), k=2/s=2
#   deconv as per-pixel D -> td*4 linear (final LN fused).
# ----------------------------------------------------------------------------
def _linear_kernel(x_ref, w_ref, b_ref, o_ref):
    o_ref[0] = jnp.dot(x_ref[0].astype(jnp.bfloat16), w_ref[...],
                       preferred_element_type=jnp.float32) + b_ref[...]


def _ln_linear_kernel(x_ref, g_ref, beta_ref, w_ref, b_ref, o_ref, *, eps):
    xn = _layernorm(x_ref[0], g_ref[...], beta_ref[...], eps)
    o_ref[0] = jnp.dot(xn.astype(jnp.bfloat16), w_ref[...],
                       preferred_element_type=jnp.float32) + b_ref[...]


def pallas_linear(x, w, b, *, ln=None, tile_target=512):
    """y = (LN(x) if ln else x) @ w + b over (token-tiles, batch).
    Output channels padded to a multiple of 128 (lane-dense stores), token
    rows padded to the tile; both sliced off afterwards."""
    B, T, Din = x.shape
    Dout = w.shape[1]
    Dpad = _round_up(Dout, 128)
    w = _bf16(w)
    if Dpad != Dout:
        w = jnp.pad(w, ((0, 0), (0, Dpad - Dout)))
        b = jnp.pad(b, (0, Dpad - Dout))
    b2d = b.reshape(1, Dpad).astype(jnp.float32)

    tt = _row_tile(T, tile_target)
    Tp = _round_up(T, tt)
    if Tp != T:
        x = jnp.pad(x, ((0, 0), (0, Tp - T), (0, 0)))

    grid = (Tp // tt, B)                       # token-tile axis leads
    x_spec = pl.BlockSpec((1, tt, Din), lambda i, n: (n, i, 0))
    o_spec = pl.BlockSpec((1, tt, Dpad), lambda i, n: (n, i, 0))

    if ln is None:
        kern = _linear_kernel
        in_specs = [x_spec, _const_spec((Din, Dpad)), _const_spec((1, Dpad))]
        args = (x, w, b2d)
    else:
        g, beta, eps = ln
        kern = functools.partial(_ln_linear_kernel, eps=eps)
        in_specs = [x_spec, _const_spec((1, Din)), _const_spec((1, Din)),
                    _const_spec((Din, Dpad)), _const_spec((1, Dpad))]
        args = (x, g.reshape(1, Din).astype(jnp.float32),
                beta.reshape(1, Din).astype(jnp.float32), w, b2d)

    y = pl.pallas_call(
        kern,
        out_shape=jax.ShapeDtypeStruct((B, Tp, Dpad), jnp.float32),
        grid=grid,
        in_specs=in_specs,
        out_specs=o_spec,
        compiler_params=_mosaic_params("parallel", "parallel"),
    )(*args)
    return y[:, :T, :Dout]


# ----------------------------------------------------------------------------
# Kernel 2: fused LN1 + single-matmul QKV projection, head-major bf16 outputs
# ----------------------------------------------------------------------------
def _qkv_kernel(x_ref, g_ref, b_ref, w_ref, q_ref, k_ref, v_ref,
                *, scale, eps, num_heads, head_dim, model_dim):
    xn = _layernorm(x_ref[0], g_ref[...], b_ref[...], eps).astype(jnp.bfloat16)
    qkv = jnp.dot(xn, w_ref[...], preferred_element_type=jnp.float32)  # (tr,3D)
    D, hd = model_dim, head_dim
    for h in range(num_heads):            # head-major splits, once per tile
        lo = h * hd
        q_ref[0, h] = (qkv[:, lo:lo + hd] * scale).astype(jnp.bfloat16)
        k_ref[0, h] = qkv[:, D + lo:D + lo + hd].astype(jnp.bfloat16)
        v_ref[0, h] = qkv[:, 2 * D + lo:2 * D + lo + hd].astype(jnp.bfloat16)


def pallas_qkv(x, lp, *, scale, num_heads, tile):
    B, S, D = x.shape
    hd = D // num_heads
    grid = (S // tile, B)
    row = pl.BlockSpec((1, tile, D), lambda i, n: (n, i, 0))
    head_major = pl.BlockSpec((1, num_heads, tile, hd),
                              lambda i, n: (n, 0, i, 0))
    out_sd = jax.ShapeDtypeStruct((B, num_heads, S, hd), jnp.bfloat16)
    wqkv = jnp.concatenate(
        [_bf16(lp["wq"]), _bf16(lp["wk"]), _bf16(lp["wv"])], axis=1)  # (D, 3D)
    return pl.pallas_call(
        functools.partial(_qkv_kernel, scale=scale, eps=1e-5,
                          num_heads=num_heads, head_dim=hd, model_dim=D),
        out_shape=(out_sd, out_sd, out_sd),
        grid=grid,
        in_specs=[row, _const_spec((1, D)), _const_spec((1, D)),
                  _const_spec((D, 3 * D))],
        out_specs=(head_major, head_major, head_major),
        compiler_params=_mosaic_params("parallel", "parallel"),
    )(x, lp["ln1_g"].reshape(1, D).astype(jnp.float32),
      lp["ln1_b"].reshape(1, D).astype(jnp.float32), wqkv)


# ----------------------------------------------------------------------------
# Kernel 3: flash attention (online softmax) + Wo + residual
# ----------------------------------------------------------------------------
def _attn_kernel(x_ref, q_ref, kt_ref, v_ref, bias_ref, wo_ref, o_ref,
                 m_scr, l_scr, acc_scr, *, num_heads):
    j = pl.program_id(2)
    n_kv = pl.num_programs(2)

    @pl.when(j == 0)
    def _():
        m_scr[...] = jnp.full_like(m_scr, -1e30)
        l_scr[...] = jnp.zeros_like(l_scr)
        acc_scr[...] = jnp.zeros_like(acc_scr)

    q = q_ref[0]                    # (nh, tq, hd) bf16, pre-scaled
    kt = kt_ref[0]                  # (nh, hd, tk) bf16, pre-transposed
    v = v_ref[0]                    # (nh, tk, hd) bf16

    # Heads ride the batch dim; q contracts on its lane dim, kT on its
    # sublane dim -> transpose-free batched MXU matmul every kv step.
    s = jnp.einsum("hqd,hdk->hqk", q, kt,
                   preferred_element_type=jnp.float32)       # (nh, tq, tk)
    s = s + bias_ref[...]                                    # -1e30 on pad keys

    m_prev = m_scr[...]
    m_new = jnp.maximum(m_prev, jnp.max(s, axis=-1, keepdims=True))
    alpha = jnp.exp(m_prev - m_new)
    p = jnp.exp(s - m_new)
    l_scr[...] = alpha * l_scr[...] + jnp.sum(p, axis=-1, keepdims=True)
    acc_scr[...] = alpha * acc_scr[...] + jnp.einsum(
        "hqk,hkd->hqd", p.astype(jnp.bfloat16), v,
        preferred_element_type=jnp.float32)
    m_scr[...] = m_new

    @pl.when(j == n_kv - 1)
    def _():
        inv_l = pl.reciprocal(l_scr[...], approx=True)       # EUP, (nh, tq, 1)
        attn = (acc_scr[...] * inv_l).astype(jnp.bfloat16)   # (nh, tq, hd)
        out = x_ref[0]                                       # residual, f32
        for h in range(num_heads):                           # epilogue only
            out = out + jnp.dot(attn[h], wo_ref[h],
                                preferred_element_type=jnp.float32)
        o_ref[0] = out


def pallas_attention(x, q, kt, v, kv_bias, wo, *, num_heads, tq, tk):
    B, S, D = x.shape
    hd = D // num_heads
    grid = (S // tq, B, S // tk)              # q-tiles lead, kv axis last
    x_spec = pl.BlockSpec((1, tq, D), lambda i, n, j: (n, i, 0))
    q_spec = pl.BlockSpec((1, num_heads, tq, hd), lambda i, n, j: (n, 0, i, 0))
    kt_spec = pl.BlockSpec((1, num_heads, hd, tk), lambda i, n, j: (n, 0, 0, j))
    v_spec = pl.BlockSpec((1, num_heads, tk, hd), lambda i, n, j: (n, 0, j, 0))
    bias_spec = pl.BlockSpec((1, 1, tk), lambda i, n, j: (0, 0, j))
    out_spec = pl.BlockSpec((1, tq, D), lambda i, n, j: (n, i, 0))
    return pl.pallas_call(
        functools.partial(_attn_kernel, num_heads=num_heads),
        out_shape=jax.ShapeDtypeStruct((B, S, D), jnp.float32),
        grid=grid,
        in_specs=[x_spec, q_spec, kt_spec, v_spec, bias_spec,
                  _const_spec((num_heads, hd, D))],
        out_specs=out_spec,
        scratch_shapes=[pltpu.VMEM((num_heads, tq, 1), jnp.float32),   # m
                        pltpu.VMEM((num_heads, tq, 1), jnp.float32),   # l
                        pltpu.VMEM((num_heads, tq, hd), jnp.float32)], # acc
        compiler_params=_mosaic_params("parallel", "parallel", "arbitrary"),
    )(x, q, kt, v, kv_bias, _bf16(wo).reshape(num_heads, hd, D))


# ----------------------------------------------------------------------------
# Kernel 4: LN2 + MLP (fc1 -> GELU -> fc2) + residual
# ----------------------------------------------------------------------------
def _mlp_kernel(x_ref, g_ref, b_ref, w1_ref, b1_ref, w2_ref, b2_ref, o_ref,
                *, eps):
    x = x_ref[0]
    xn = _layernorm(x, g_ref[...], b_ref[...], eps)
    h1 = jnp.dot(xn.astype(jnp.bfloat16), w1_ref[...],
                 preferred_element_type=jnp.float32) + b1_ref[...]
    h1 = jax.nn.gelu(h1, approximate=False)                  # exact erf GELU
    h2 = jnp.dot(h1.astype(jnp.bfloat16), w2_ref[...],
                 preferred_element_type=jnp.float32) + b2_ref[...]
    o_ref[0] = x + h2


def pallas_mlp(x, lp, *, tile):
    B, S, D = x.shape
    Dm = lp["w1"].shape[1]
    grid = (S // tile, B)
    row = pl.BlockSpec((1, tile, D), lambda i, n: (n, i, 0))
    return pl.pallas_call(
        functools.partial(_mlp_kernel, eps=1e-5),
        out_shape=jax.ShapeDtypeStruct((B, S, D), jnp.float32),
        grid=grid,
        in_specs=[row,
                  _const_spec((1, D)), _const_spec((1, D)),
                  _const_spec((D, Dm)), _const_spec((1, Dm)),
                  _const_spec((Dm, D)), _const_spec((1, D))],
        out_specs=row,
        compiler_params=_mosaic_params("parallel", "parallel"),
    )(x,
      lp["ln2_g"].reshape(1, D).astype(jnp.float32),
      lp["ln2_b"].reshape(1, D).astype(jnp.float32),
      _bf16(lp["w1"]), lp["b1"].reshape(1, Dm).astype(jnp.float32),
      _bf16(lp["w2"]), lp["b2"].reshape(1, D).astype(jnp.float32))


def pallas_transformer_layer(x, kv_bias, lp, *, num_heads, tq, tk):
    B, S, D = x.shape
    hd = D // num_heads
    tr = max(tq, tk)
    q, k, v = pallas_qkv(x, lp, scale=1.0 / math.sqrt(hd),
                         num_heads=num_heads, tile=tr)
    kt = jnp.swapaxes(k, 2, 3)     # (B, nh, hd, S); amortized over all q-tiles
    xa = pallas_attention(x, q, kt, v, kv_bias, lp["wo"],
                          num_heads=num_heads, tq=tq, tk=tk)
    return pallas_mlp(xa, lp, tile=tr)


# ----------------------------------------------------------------------------
# Full TriplaneTransformer forward (glue in JAX, compute in Pallas kernels)
# ----------------------------------------------------------------------------
def triplane_transformer_forward(image_feats, params, *, triplane_low_res,
                                 num_heads):
    N, T, _ = image_feats.shape
    H = W = triplane_low_res
    L = 3 * H * W
    D = params["pos_embed"].shape[-1]
    td = params["deconv_b"].shape[0]
    final_ln = (params["norm_g"], params["norm_b"], 1e-6)

    # PreprocessImageFeats: ConvTranspose2d(k=1) == per-token linear
    feats = pallas_linear(image_feats, params["pre_w"], params["pre_b"])

    x = jnp.broadcast_to(params["pos_embed"], (N, L, D)).astype(jnp.float32)
    xc = jnp.concatenate([x, feats], axis=1)                  # (N, S, D)
    S = L + T

    # Pad the sequence to the attention tile; padded keys get a -1e30 bias
    # (exact zero softmax weight), padded rows are sliced off afterwards.
    tq, tk, S_pad = _attn_tiles(S)
    if S_pad != S:
        xc = jnp.pad(xc, ((0, 0), (0, S_pad - S), (0, 0)))
    kv_bias = jnp.where(jnp.arange(S_pad) < S, 0.0, -1e30).astype(
        jnp.float32).reshape(1, 1, S_pad)

    for lp in params["layers"]:
        xc = pallas_transformer_layer(xc, kv_bias, lp,
                                      num_heads=num_heads, tq=tq, tk=tk)

    xc = xc[:, :S, :]
    x_tri = xc[:, :L, :]
    image_out = xc[:, L:, :]

    # Final LayerNorm (eps=1e-6) is per-token, so it is fused into the two
    # projection kernels below.
    image_out = pallas_linear(image_out, params["post_w"], params["post_b"],
                              ln=final_ln)

    # deconv: LN + ConvTranspose2d(D, td, kernel=2, stride=2) == per-pixel
    # linear D -> td*4, followed by the 2x2 pixel reassembly.
    x5 = x_tri.reshape(N, 3, H, W, D)
    xp = jnp.transpose(x5, (1, 0, 2, 3, 4)).reshape(3 * N, H * W, D)
    w_flat = params["deconv_w"].reshape(D, td * 4)
    b_flat = jnp.repeat(params["deconv_b"], 4)
    y = pallas_linear(xp, w_flat, b_flat, ln=final_ln)        # (3N, HW, td*4)
    y = y.reshape(3, N, H, W, td, 2, 2)
    y = jnp.transpose(y, (1, 0, 4, 2, 5, 3, 6)).reshape(N, 3, td, 2 * H, 2 * W)
    return y, image_out


# ----------------------------------------------------------------------------
# Pure-JAX reference (f32 math on the same bf16-stored weights)
# ----------------------------------------------------------------------------
def _f32(a):
    return a.astype(jnp.float32)


def _ref_ln(x, g, b, eps):
    mu = x.mean(-1, keepdims=True)
    xc = x - mu
    var = (xc * xc).mean(-1, keepdims=True)
    return xc / jnp.sqrt(var + eps) * g + b


def _ref_block(x, lp, num_heads):
    B, S, D = x.shape
    hd = D // num_heads
    xn = _ref_ln(x, lp["ln1_g"], lp["ln1_b"], 1e-5)
    q = (xn @ _f32(lp["wq"])).reshape(B, S, num_heads, hd).transpose(0, 2, 1, 3)
    k = (xn @ _f32(lp["wk"])).reshape(B, S, num_heads, hd).transpose(0, 2, 1, 3)
    v = (xn @ _f32(lp["wv"])).reshape(B, S, num_heads, hd).transpose(0, 2, 1, 3)
    s = jnp.einsum("bhqd,bhkd->bhqk", q, k) / jnp.sqrt(hd)
    p = jax.nn.softmax(s, axis=-1)
    o = jnp.einsum("bhqk,bhkd->bhqd", p, v).transpose(0, 2, 1, 3).reshape(B, S, D)
    x = x + o @ _f32(lp["wo"])
    xn2 = _ref_ln(x, lp["ln2_g"], lp["ln2_b"], 1e-5)
    h = jax.nn.gelu(xn2 @ _f32(lp["w1"]) + lp["b1"], approximate=False)
    return x + h @ _f32(lp["w2"]) + lp["b2"]


def reference_forward(image_feats, params, *, triplane_low_res, num_heads):
    N, T, _ = image_feats.shape
    H = W = triplane_low_res
    L = 3 * H * W
    D = params["pos_embed"].shape[-1]
    td = params["deconv_b"].shape[0]
    feats = image_feats @ _f32(params["pre_w"]) + params["pre_b"]
    x = jnp.broadcast_to(params["pos_embed"], (N, L, D))
    xc = jnp.concatenate([x, feats], axis=1)
    for lp in params["layers"]:
        xc = _ref_block(xc, lp, num_heads)
    xc = _ref_ln(xc, params["norm_g"], params["norm_b"], 1e-6)
    x = xc[:, :L, :]
    image_out = xc[:, L:, :] @ _f32(params["post_w"]) + params["post_b"]
    x5 = x.reshape(N, 3, H, W, D)
    xp = jnp.transpose(x5, (1, 0, 2, 3, 4)).reshape(3 * N, H * W, D)
    y = xp @ _f32(params["deconv_w"]).reshape(D, td * 4) + jnp.repeat(
        params["deconv_b"], 4)
    y = y.reshape(3, N, H, W, td, 2, 2)
    y = jnp.transpose(y, (1, 0, 4, 2, 5, 3, 6)).reshape(N, 3, td, 2 * H, 2 * W)
    return y, image_out


# ----------------------------------------------------------------------------
# Parameter construction (deterministic, synthetic; matmul weights in bf16)
# ----------------------------------------------------------------------------
def make_params(key, *, inner_dim, image_feat_dim, triplane_low_res,
                triplane_dim, num_layers, mlp_ratio=4.0):
    D = inner_dim
    Dm = int(D * mlp_ratio)
    L = 3 * triplane_low_res ** 2
    scale = 0.05
    keys = iter(jax.random.split(key, 8 + 8 * num_layers))
    bf16 = jnp.bfloat16

    def nrm(shape, s=scale, dtype=jnp.float32):
        return (s * jax.random.normal(next(keys), shape)).astype(dtype)

    layers = []
    for _ in range(num_layers):
        layers.append(dict(
            ln1_g=jnp.ones((D,), jnp.float32), ln1_b=jnp.zeros((D,), jnp.float32),
            wq=nrm((D, D), dtype=bf16), wk=nrm((D, D), dtype=bf16),
            wv=nrm((D, D), dtype=bf16), wo=nrm((D, D), dtype=bf16),
            ln2_g=jnp.ones((D,), jnp.float32), ln2_b=jnp.zeros((D,), jnp.float32),
            w1=nrm((D, Dm), dtype=bf16), b1=nrm((Dm,)),
            w2=nrm((Dm, D), dtype=bf16), b2=nrm((D,)),
        ))

    return dict(
        pos_embed=(jax.random.normal(next(keys), (1, L, D)) * (1.0 / D) ** 0.5
                   ).astype(jnp.float32),
        layers=layers,
        norm_g=jnp.ones((D,), jnp.float32),
        norm_b=jnp.zeros((D,), jnp.float32),
        deconv_w=nrm((D, triplane_dim, 2, 2), dtype=bf16),
        deconv_b=nrm((triplane_dim,)),
        pre_w=nrm((image_feat_dim, D), dtype=bf16),  # ConvTranspose2d k=1 [ic,oc]
        pre_b=nrm((D,)),
        post_w=nrm((D, image_feat_dim), dtype=bf16),
        post_b=nrm((image_feat_dim,)),
    )


# ----------------------------------------------------------------------------
if __name__ == "__main__":
    N = 2
    inner_dim = 32
    image_feat_dim = 16
    triplane_low_res = 4
    triplane_dim = 8
    num_layers = 2
    num_heads = 4
    num_tokens = 8

    root = jax.random.PRNGKey(0)
    k_params, k_inp = jax.random.split(root)
    params = make_params(k_params, inner_dim=inner_dim,
                         image_feat_dim=image_feat_dim,
                         triplane_low_res=triplane_low_res,
                         triplane_dim=triplane_dim, num_layers=num_layers)
    image_feats = jax.random.normal(k_inp, (N, num_tokens, image_feat_dim),
                                    dtype=jnp.float32)

    tri, feats_out = triplane_transformer_forward(
        image_feats, params, triplane_low_res=triplane_low_res,
        num_heads=num_heads)
    jax.block_until_ready((tri, feats_out))

    # shape checks (match PyTorch semantics)
    assert tri.shape == (N, 3, triplane_dim, 2 * triplane_low_res,
                         2 * triplane_low_res)
    assert feats_out.shape == (N, num_tokens, image_feat_dim)

    # numerical check against pure-JAX reference
    tri_ref, feats_ref = reference_forward(
        image_feats, params, triplane_low_res=triplane_low_res,
        num_heads=num_heads)
    assert bool(jnp.all(jnp.isfinite(tri))) and bool(jnp.all(jnp.isfinite(feats_out)))
    assert jnp.allclose(tri, tri_ref, atol=5e-2, rtol=5e-2), \
        f"triplane max diff {float(jnp.max(jnp.abs(tri - tri_ref)))}"
    assert jnp.allclose(feats_out, feats_ref, atol=5e-2, rtol=5e-2), \
        f"feats max diff {float(jnp.max(jnp.abs(feats_out - feats_ref)))}"

    print("KERNEL_OK")
</pallas_src>

<mosaic_0001>
module attributes {stable_mosaic.version = 11 : i64} {
  func.func @_k(%arg0: i32, %arg1: memref<8x128xf32, #tpu.memory_space<vmem>>, %arg2: memref<8x128xf32, #tpu.memory_space<vmem>>, %arg3: memref<8x128xf32, #tpu.memory_space<vmem>>) attributes {dimension_semantics = [#tpu.dimension_semantics<arbitrary>], iteration_bounds = array<i64: 2>, scalar_prefetch = 0 : i64, scratch_operands = 0 : i64, tpu.core_type = #tpu.core_type<tc>, window_params = [{transform_indices = @transform_0, window_bounds = array<i64: 8, 128>}, {pipeline_mode = #tpu.pipeline_mode<synchronous>, transform_indices = @transform_1, window_bounds = array<i64: 8, 128>}, {transform_indices = @transform_2, window_bounds = array<i64: 8, 128>}]} {
    %c0 = arith.constant 0 : index
    %c0_0 = arith.constant 0 : index
    %0 = vector.load %arg1[%c0, %c0_0] : memref<8x128xf32, #tpu.memory_space<vmem>>, vector<8x128xf32>
    %c0_1 = arith.constant 0 : index
    %c0_2 = arith.constant 0 : index
    %1 = vector.load %arg2[%c0_1, %c0_2] : memref<8x128xf32, #tpu.memory_space<vmem>>, vector<8x128xf32>
    %2 = arith.addf %0, %1 : vector<8x128xf32>
    %c0_3 = arith.constant 0 : index
    %c0_4 = arith.constant 0 : index
    %3 = vector.load %arg3[%c0_3, %c0_4] : memref<8x128xf32, #tpu.memory_space<vmem>>, vector<8x128xf32>
    tpu.vector_store %arg3[%c0_3, %c0_4], %2 {strides = array<i32>} : memref<8x128xf32, #tpu.memory_space<vmem>>, vector<8x128xf32>,
    return
  }
  func.func @transform_0(%arg0: i32) -> (i32, i32) {
    %c0_i32 = arith.constant 0 : i32
    %c0_i32_0 = arith.constant 0 : i32
    return %arg0, %c0_i32 : i32, i32
  }
  func.func @transform_1(%arg0: i32) -> (i32, i32) {
    %c0_i32 = arith.constant 0 : i32
    %c0_i32_0 = arith.constant 0 : i32
    %c0_i32_1 = arith.constant 0 : i32
    return %c0_i32, %c0_i32_0 : i32, i32
  }
  func.func @transform_2(%arg0: i32) -> (i32, i32) {
    %c0_i32 = arith.constant 0 : i32
    %c0_i32_0 = arith.constant 0 : i32
    return %arg0, %c0_i32 : i32, i32
  }
}

module attributes {stable_mosaic.version = 11 : i64} {
  func.func @_linear_kernel(%arg0: i32, %arg1: i32, %arg2: memref<1x8x16xf32, #tpu.memory_space<vmem>>, %arg3: memref<16x128xbf16, #tpu.memory_space<vmem>>, %arg4: memref<1x128xf32, #tpu.memory_space<vmem>>, %arg5: memref<1x8x128xf32, #tpu.memory_space<vmem>>) attributes {dimension_semantics = [#tpu.dimension_semantics<parallel>, #tpu.dimension_semantics<parallel>], iteration_bounds = array<i64: 1, 2>, scalar_prefetch = 0 : i64, scratch_operands = 0 : i64, tpu.core_type = #tpu.core_type<tc>, window_params = [{transform_indices = @transform_0, window_bounds = array<i64: 1, 8, 16>}, {pipeline_mode = #tpu.pipeline_mode<synchronous>, transform_indices = @transform_1, window_bounds = array<i64: 16, 128>}, {pipeline_mode = #tpu.pipeline_mode<synchronous>, transform_indices = @transform_2, window_bounds = array<i64: 1, 128>}, {transform_indices = @transform_3, window_bounds = array<i64: 1, 8, 128>}]} {
    %c0 = arith.constant 0 : index
    %c0_0 = arith.constant 0 : index
    %c0_1 = arith.constant 0 : index
    %0 = vector.load %arg2[%c0, %c0_0, %c0_1] : memref<1x8x16xf32, #tpu.memory_space<vmem>>, vector<1x8x16xf32>
    %1 = vector.shape_cast %0 : vector<1x8x16xf32> to vector<8x16xf32>
    %2 = arith.truncf %1 : vector<8x16xf32> to vector<8x16xbf16>
    %c0_2 = arith.constant 0 : index
    %c0_3 = arith.constant 0 : index
    %3 = vector.load %arg3[%c0_2, %c0_3] : memref<16x128xbf16, #tpu.memory_space<vmem>>, vector<16x128xbf16>
    %cst = arith.constant dense<0.000000e+00> : vector<8x128xf32>
    %4 = tpu.matmul %2, %3, %cst {dimension_numbers = #tpu.dot_dimension_numbers<[1], [0], [0], [1], [0, 0, 1, 1], [], []>} : vector<8x16xbf16>, vector<16x128xbf16>, vector<8x128xf32> -> vector<8x128xf32>
    %c0_4 = arith.constant 0 : index
    %c0_5 = arith.constant 0 : index
    %5 = vector.load %arg4[%c0_4, %c0_5] : memref<1x128xf32, #tpu.memory_space<vmem>>, vector<1x128xf32>
    %6 = vector.broadcast %5 : vector<1x128xf32> to vector<8x128xf32>
    %7 = arith.addf %4, %6 : vector<8x128xf32>
    %c0_6 = arith.constant 0 : index
    %c0_7 = arith.constant 0 : index
    %c0_8 = arith.constant 0 : index
    %8 = vector.load %arg5[%c0_6, %c0_7, %c0_8] : memref<1x8x128xf32, #tpu.memory_space<vmem>>, vector<1x8x128xf32>
    %9 = vector.shape_cast %8 : vector<1x8x128xf32> to vector<8x128xf32>
    %10 = vector.shape_cast %7 : vector<8x128xf32> to vector<1x8x128xf32>
    tpu.vector_store %arg5[%c0_6, %c0_7, %c0_8], %10 {strides = array<i32>} : memref<1x8x128xf32, #tpu.memory_space<vmem>>, vector<1x8x128xf32>,
    return
  }
  func.func @transform_0(%arg0: i32, %arg1: i32) -> (i32, i32, i32) {
    %c0_i32 = arith.constant 0 : i32
    %c0_i32_0 = arith.constant 0 : i32
    return %arg1, %arg0, %c0_i32 : i32, i32, i32
  }
  func.func @transform_1(%arg0: i32, %arg1: i32) -> (i32, i32) {
    %c0_i32 = arith.constant 0 : i32
    %c0_i32_0 = arith.constant 0 : i32
    %c0_i32_1 = arith.constant 0 : i32
    return %c0_i32, %c0_i32_0 : i32, i32
  }
  func.func @transform_2(%arg0: i32, %arg1: i32) -> (i32, i32) {
    %c0_i32 = arith.constant 0 : i32
    %c0_i32_0 = arith.constant 0 : i32
    %c0_i32_1 = arith.constant 0 : i32
    return %c0_i32, %c0_i32_0 : i32, i32
  }
  func.func @transform_3(%arg0: i32, %arg1: i32) -> (i32, i32, i32) {
    %c0_i32 = arith.constant 0 : i32
    %c0_i32_0 = arith.constant 0 : i32
    return %arg1, %arg0, %c0_i32 : i32, i32, i32
  }
}

</mosaic_0001>

<bundles_post_ra>
// kernel: tpu_custom_call.1
= control target key start
LH: loop header
LB: loop body
LE: loop exit
PB: predicated region body
PF: predicated region fallthrough
CT: control target
= control target key end

     0   :  { %7 = vsyncpa [#allocation3], 0  ;;  %s649_s0 = inlined_call_operand.hbm [shape: f32[16,128], index: 0, kind: input, shape index: {}]   ;;  %s650_s1 = inlined_call_operand.hbm [shape: f32[8,128], index: 1, kind: input, shape index: {}]   ;;  %s651_s2 = inlined_call_operand.hbm [shape: f32[16,128], index: 2, kind: output, shape index: {}]  }
   0x1   :  { %9 = vsyncpa [#allocation3 + $0x1], 0 }
   0x2   :  { %10 = vsyncpa [#allocation6], 0 }
   0x3   :  { %11 = vsyncpa [#allocation4], 0 }
   0x4   :  { %13 = vsyncpa [#allocation4 + $0x1], 0  ;;  %s483_s9 = smov 0   ;;  %s485_s10 = smov 0  }
   0x5   :  { %s487_s11 = smov 0   ;;  %s489_s12 = smov 0  }
   0x6 LB: > { %s504_s13 = sadd.s32 4294967295, %s463_s12   ;;  %s270_s14 = sadd.s32 4294967294, %s463_s12   ;;  %s463_s12 = sphi %s489_s12, %s674_s12   ;;  %s459_s11 = sphi %s487_s11, %s673_s11   ;;  %s455_s10 = sphi %s485_s10, %s672_s10   ;;  %s451_s9 = sphi %s483_s9, %s671_s9  }
   0x7   : > { %p39_p0 = scmp.ne.s32.totalorder %s455_s10, %s451_s9  ;;  %p652_p1 = scmp.eq.s32.totalorder %s504_s13, 0 }
   0x8   : > { %p90_p3 = scmp.eq.s32.totalorder %s270_s14, 1  ;;  %p271_p5 = scmp.ge.s32.totalorder %s463_s12, 1 }
   0x9   : > { %p513_p4 = por %p652_p1, %p39_p0  ;;  %p97_p7 = scmp.lt.s32.totalorder %s463_s12, 3 }
   0xa   : > { %p518_p6 = por %p90_p3, %p39_p0  ;;  %s465_s18 = smov [#allocation5]  }
   0xb   : > { %s656_s15 = scalar_select %p513_p4, 1, 0 }
   0xc   : > { %s657_s16 = scalar_select %p518_p6, 1, 0 }
   0xd   : > { %p523_p8 = pnand %p271_p5, %p97_p7  ;;  %s110_s19 = sshll.u32 %s465_s18, 4  ;;  %s111_s19 = int_to_ptr.vmem [resolvable:$true] %s110_s19 }
   0xe   : > { %s531_s20 = sadd.s32 1, %s463_s12   ;;  %s26_s24 = sadd.s32 1, %s459_s11 }
   0xf   : > { %s658_s17 = scalar_select %p523_p8, 1, 0 }
  0x10   : > { %p292_p10 = pneg %p523_p8  ;;  %s23_s22 = ssub.s32 %s463_s12, %s531_s20 }
  0x11   : > { %p541_p12 = scmp.eq.s32.totalorder %s23_s22, 0  ;;  %p33_p13 = scmp.ne.s32.totalorder %s459_s11, %s455_s10 }
  0x12   : > { %p535_p11 = pnand %p292_p10, %p652_p1  ;;  %s352_s25 = scalar_lea.vmem %s111_s19, 128 }
  0x13   : > { %p353_p3 = scmp.ne.s32.totalorder %s111_s19, %s352_s25  ;;  %p360_p9 = scmp.lt.s32.totalorder %s111_s19, %s111_s19 }
  0x14   : > { %p343_p0 = pneg %p535_p11  ;;  %p361_p2 = scmp.lt.s32.totalorder %s352_s25, %s352_s25 }
  0x16   : > { %p355_p5 = pnand %p353_p3, %p343_p0  ;;  %p362_p10 = por %p361_p2, %p360_p9 }
  0x18   : > { %p356_p7 = pneg %p355_p5 }
  0x1a   : > { %p363_p1 = pnand %p362_p10, %p356_p7 }
  0x1c   : > { %366 = shalt.err (!%p363_p1)
}
  0x1d   : > { %295 = dma.hbm_to_vmem [thread:$0]  (!%p535_p11), %s650_s1, 128, %s111_s19, [#allocation6]  }
  0x1e   : > { %s558_s28 = scalar_select %p541_p12, %s459_s11, %s26_s24  }
  0x1f   : > { %p34_p1 = scmp.eq.s32.totalorder %s463_s12, 0  ;;  %p661_p2 = scmp.eq.s32.totalorder %s504_s13, 1 }
  0x20   : > { %p305_p0 = scmp.lt.s32.totalorder %s463_s12, 2  ;;  %s121_s30 = sand.u32 1, %s459_s11  }
  0x21   : > { %p566_p9 = por %p661_p2, %p33_p13  ;;  %p35_p3 = por %p34_p1, %p33_p13 }
  0x22   : > { %s274_s3 = sshll.u32 %s121_s30, 3  ;;  %s275_s4 = sshll.u32 %s463_s12, 7 }
  0x23   : > { %s662_s29 = scalar_select %p566_p9, 1, 0 }
  0x24   : > { %s579_s7 = scalar_lea.hbm %s649_s0, %s275_s4  ;;  %s125_s8 = scalar_lea.vmem [#allocation2], %s274_s3 }
  0x25   : > { %s132_s14 = sshll.u32 %s125_s8, 4  ;;  %p581_p11 = pnand %p305_p0, %p35_p3  ;;  %s133_s14 = int_to_ptr.vmem [resolvable:$true] %s132_s14 }
  0x26   : > { %s122_s19 = scalar_lea.sflag [#allocation3], %s121_s30  ;;  %s367_s21 = scalar_lea.hbm %s579_s7, 128 }
  0x27   : > { %p368_p12 = scmp.ne.s32.totalorder %s579_s7, %s367_s21  ;;  %p369_p13 = pneg %p581_p11 }
  0x28   : > { %s372_s24 = scalar_lea.hbm %s649_s0, 256  ;;  %p373_p10 = scmp.lt.s32.totalorder %s579_s7, %s649_s0 }
  0x29   : > { %p370_p5 = pnand %p369_p13, %p368_p12  ;;  %p374_p1 = scmp.lt.s32.totalorder %s372_s24, %s367_s21 }
  0x2b   : > { %p371_p7 = pneg %p370_p5  ;;  %p375_p2 = por %p374_p1, %p373_p10 }
  0x2d   : > { %p376_p0 = pnand %p375_p2, %p371_p7 }
  0x2f   : > { %379 = shalt.err (!%p376_p0)
}
  0x30   : > { %s380_s27 = scalar_lea.vmem %s133_s14, 128  ;;  %s466_s30 = smov [#allocation2]  }
  0x31   : > { %p381_p3 = scmp.ne.s32.totalorder %s133_s14, %s380_s27  ;;  %s385_s3 = sshll.u32 %s466_s30, 4  ;;  %s386_s3 = int_to_ptr.vmem [resolvable:$false] %s385_s3 }
  0x32   : > { %s387_s4 = scalar_lea.vmem %s386_s3, 256  ;;  %p388_p12 = scmp.lt.s32.totalorder %s133_s14, %s386_s3 }
  0x33   : > { %p383_p6 = pnand %p381_p3, %p369_p13  ;;  %p389_p5 = scmp.lt.s32.totalorder %s387_s4, %s380_s27 }
  0x35   : > { %p384_p9 = pneg %p383_p6  ;;  %p390_p4 = por %p389_p5, %p388_p12 }
  0x37   : > { %p391_p8 = pnand %p390_p4, %p384_p9 }
  0x39   : > { %394 = shalt.err (!%p391_p8)
}
  0x3a   : > { %299 = dma.hbm_to_vmem [thread:$0]  (!%p581_p11), %s579_s7, 128, %s133_s14, %s122_s19  }
  0x3b   : > { %p664_p7 = scmp.ne.s32.totalorder %s658_s17, 0 }
  0x3c   : > { %s602_s5 = sand.u32 (!%p664_p7), 1, %s455_s10   ;;  %p665_p6 = scmp.ne.s32.totalorder (!%p664_p7), %s656_s15, 0 }
  0x3d   : > { %141 = sbr.rel (%p664_p7) target bundleno = 95 (0x5f), region = 28  ;;  %s277_s6 = sshll.u32 (!%p664_p7), %s602_s5, 3 }
  0x3e   : > { %s144_s8 = scalar_lea.sflag (!%p664_p7), [#allocation3], %s602_s5  ;;  %s147_s21 = scalar_lea.vmem (!%p664_p7), [#allocation2], %s277_s6 }
  0x42   : > { %438 = dma.done.wait (%p665_p6), %s144_s8, 128  }
  0x43   : > { %440 = vsyncadd (%p665_p6), %s144_s8, 4294967168  ;;  %p666_p4 = scmp.eq.s32.totalorder %s504_s13, 0 }
  0x45   : > { %442 = dma.done.wait (%p666_p4), [#allocation6], 128   ;;  %p667_p8 = pmov %p666_p4 }
  0x46   : > { %s171_s17 = scalar_lea.vmem [#allocation7], %s277_s6  ;;  %s281_s14 = sshll.u32 %s504_s13, 7  ;;  %v172_v0 = vld [vmem:[%s147_s21] sm:$0xff]  ;;  %v173_v1 = vld [vmem:[#allocation5] sm:$0xff] }
  0x47   : > { %444 = vsyncadd (%p667_p8), [#allocation6], 4294967168  ;;  %s190_s7 = sshll.u32 %s171_s17, 4  ;;  %v174_v2 = vadd.f32 %v173_v1, %v172_v0  ;;  %s188_s15 = scalar_lea.hbm %s651_s2, %s281_s14  ;;  %s191_s7 = int_to_ptr.vmem [resolvable:$true] %s190_s7 }
  0x48   : > { %s177_s22 = scalar_lea.sflag [#allocation4], %s602_s5  ;;  %s395_s23 = scalar_lea.vmem %s191_s7, 128 }
  0x49   : > { %175 = vst [vmem:[%s171_s17] sm:$0xff] %v174_v2  ;;  %p396_p9 = scmp.ne.s32.totalorder %s191_s7, %s395_s23  ;;  %p668_p11 = scmp.ne.s32.totalorder %s662_s29, 0 }
  0x4a   : > { %s467_s24 = smov [#allocation7]  }
  0x4b   : > { %p397_p13 = pnand %p396_p9, %p668_p11  ;;  %s399_s25 = sshll.u32 %s467_s24, 4  ;;  %s400_s25 = int_to_ptr.vmem [resolvable:$false] %s399_s25 }
  0x4c   : > { %s401_s26 = scalar_lea.vmem %s400_s25, 256  ;;  %p402_p1 = scmp.lt.s32.totalorder %s191_s7, %s400_s25 }
  0x4d   : > { %p398_p10 = pneg %p397_p13  ;;  %p403_p2 = scmp.lt.s32.totalorder %s401_s26, %s395_s23 }
  0x4f   : > { %p404_p0 = por %p403_p2, %p402_p1 }
  0x51   : > { %p405_p3 = pnand %p404_p0, %p398_p10 }
  0x53   : > { %408 = shalt.err (!%p405_p3)
}
  0x54   : > { %s409_s13 = scalar_lea.hbm %s188_s15, 128  ;;  %s413_s3 = scalar_lea.hbm %s651_s2, 256 }
  0x55   : > { %p410_p12 = scmp.ne.s32.totalorder %s188_s15, %s409_s13  ;;  %p414_p6 = scmp.lt.s32.totalorder %s188_s15, %s651_s2 }
  0x56   : > { %p415_p4 = scmp.lt.s32.totalorder %s413_s3, %s409_s13 }
  0x57   : > { %p411_p5 = pnand %p410_p12, %p668_p11 }
  0x58   : > { %p416_p8 = por %p415_p4, %p414_p6 }
  0x59   : > { %p412_p7 = pneg %p411_p5 }
  0x5b   : > { %p417_p9 = pnand %p416_p8, %p412_p7 }
  0x5d   : > { %420 = shalt.err (!%p417_p9)
}
  0x5e   : > { %290 = dma.vmem_to_hbm [thread:$0]  (%p668_p11), %s191_s7, 128, %s188_s15, %s177_s22  }
  0x5f PF: > { %s202_s6 = sand.u32 1, %s451_s9   ;;  %p669_p13 = scmp.ne.s32.totalorder %s657_s16, 0 }
  0x60   : > { %p670_p10 = scmp.ge.s32.totalorder %s463_s12, 2  ;;  %s203_s8 = scalar_lea.sflag [#allocation4], %s202_s6 }
  0x62   : > { %p301_p1 = pnand %p670_p10, %p669_p13 }
  0x64   : > { %p302_p2 = pneg %p301_p1 }
  0x66   : > { %446 = dma.done.wait (%p302_p2), %s203_s8, 128  }
  0x67   : > { %448 = vsyncadd (%p302_p2), %s203_s8, 4294967168  ;;  %p16_p0 = scmp.ge.s32.totalorder %s531_s20, 4   ;;  %s671_s9 = smov %s455_s10 }
  0x68   : > { %s672_s10 = smov %s459_s11  ;;  %s673_s11 = smov %s558_s28 }
  0x69   : > { %s674_s12 = smov %s531_s20  ;;  %18 = sbr.rel (!%p16_p0) target bundleno = 6 (0x6), region = 77 }
  0x6e   :  { %208 = vsyncpa [#allocation3], 1 }
  0x6f   :  { %210 = vsyncpa [#allocation3 + $0x1], 1 }
  0x70   :  { %211 = vsyncpa [#allocation6], 1 }
  0x71   :  { %212 = vsyncpa [#allocation4], 1 }
  0x72   :  { %214 = vsyncpa [#allocation4 + $0x1], 1 }

// kernel: tpu_custom_call.1
= control target key start
LH: loop header
LB: loop body
LE: loop exit
PB: predicated region body
PF: predicated region fallthrough
CT: control target
= control target key end

     0   :  { %8 = vsyncpa [#allocation3], 0  ;;  %s839_s0 = inlined_call_operand.hbm [shape: f32[2,8,16], index: 0, kind: input, shape index: {}]   ;;  %s840_s1 = inlined_call_operand.hbm [shape: bf16[16,128], index: 1, kind: input, shape index: {}]   ;;  %s841_s2 = inlined_call_operand.vmem [shape: f32[1,128], index: 2, kind: input, shape index: {}]   ;;  %s842_s3 = inlined_call_operand.hbm [shape: f32[2,8,128], index: 3, kind: output, shape index: {}]  }
   0x1   :  { %10 = vsyncpa [#allocation3 + $0x1], 0 }
   0x2   :  { %11 = vsyncpa [#allocation6], 0 }
   0x3   :  { %12 = vsyncpa [#allocation4], 0 }
   0x4   :  { %14 = vsyncpa [#allocation4 + $0x1], 0  ;;  %s657_s12 = smov 0   ;;  %s659_s13 = smov 0  }
   0x5   :  { %s661_s14 = smov 0   ;;  %s663_s15 = smov 0  }
   0x6   :  { %s665_s16 = smov 0   ;;  %s667_s17 = smov 0  }
   0x7 LB: > { %s386_s18 = sadd.s32 4294967295, %s628_s17   ;;  %s387_s19 = sadd.s32 4294967294, %s628_s17   ;;  %s628_s17 = sphi %s667_s17, %s20_s17   ;;  %s624_s16 = sphi %s665_s16, %s860_s16   ;;  %s620_s15 = sphi %s663_s15, %s859_s15   ;;  %s616_s14 = sphi %s661_s14, %s858_s14   ;;  %s612_s13 = sphi %s659_s13, %s857_s13   ;;  %s608_s12 = sphi %s657_s12, %s856_s12  }
   0x8   : > { %p54_p0 = scmp.ne.s32.totalorder %s612_s13, %s608_s12  ;;  %p691_p1 = scmp.eq.s32.totalorder %s386_s18, 0 }
   0x9   : > { %p695_p2 = scmp.eq.s32.totalorder %s386_s18, 1  ;;  %p128_p3 = scmp.eq.s32.totalorder %s387_s19, 1 }
   0xa   : > { %p701_p4 = por %p691_p1, %p54_p0  ;;  %p388_p5 = scmp.ge.s32.totalorder %s628_s17, 1 }
   0xb   : > { %p706_p6 = por %p128_p3, %p54_p0  ;;  %p135_p7 = scmp.lt.s32.totalorder %s628_s17, 3 }
   0xc   : > { %s846_s22 = scalar_select %p701_p4, 1, 0 }
   0xd   : > { %s847_s23 = scalar_select %p706_p6, 1, 0 }
   0xe   : > { %p711_p8 = pnand %p388_p5, %p135_p7  ;;  %s630_s25 = smov [#allocation5]  }
   0xf   : > { %s147_s26 = sshll.u32 %s630_s25, 4  ;;  %s29_s28 = sadd.s32 1, %s624_s16  ;;  %s148_s26 = int_to_ptr.vmem [resolvable:$true] %s147_s26 }
  0x10   : > { %p420_p9 = pneg %p711_p8  ;;  %s501_s29 = scalar_lea.vmem %s148_s26, 128 }
  0x11   : > { %p502_p13 = scmp.ne.s32.totalorder %s148_s26, %s501_s29  ;;  %p509_p5 = scmp.lt.s32.totalorder %s148_s26, %s148_s26 }
  0x12   : > { %p720_p11 = pnand %p420_p9, %p691_p1  ;;  %p510_p7 = scmp.lt.s32.totalorder %s501_s29, %s501_s29 }
  0x14   : > { %p492_p12 = pneg %p720_p11  ;;  %p511_p6 = por %p510_p7, %p509_p5 }
  0x16   : > { %p504_p0 = pnand %p502_p13, %p492_p12 }
  0x18   : > { %p505_p3 = pneg %p504_p0 }
  0x1a   : > { %p512_p4 = pnand %p511_p6, %p505_p3 }
  0x1c   : > { %515 = shalt.err (!%p512_p4)
}
  0x1d   : > { %s631_s30 = smov 64   ;;  %s632_s4 = smov 4  }
  0x1e   : > { %423 = dma.hbm_to_vmem [thread:$0]  (!%p720_p11), %s840_s1, 128, %s148_s26, [#allocation6], %s631_s30, %s631_s30, %s632_s4  }
  0x1f   : > { %p30_p6 = scmp.ge.s32.totalorder %s29_s28, 2  ;;  %s41_s7 = sadd.s32 1, %s616_s14 }
  0x20   : > { %p48_p4 = scmp.ne.s32.totalorder %s616_s14, %s612_s13  ;;  %p49_p9 = scmp.eq.s32.totalorder %s628_s17, 0 }
  0x21   : > { %s862_s28 = smov (%p30_p6, %s29_s28), 0  ;;  %p433_p0 = scmp.lt.s32.totalorder %s628_s17, 2 }
  0x22   : > { %p738_p12 = por %p49_p9, %p48_p4  ;;  %p744_p13 = por %p695_p2, %p48_p4 }
  0x23   : > { %s36_s10 = ssub.s32 %s624_s16, %s862_s28  ;;  %s164_s11 = sand.u32 1, %s616_s14  }
  0x24   : > { %p39_p11 = scmp.eq.s32.totalorder %s36_s10, 0  ;;  %s391_s18 = sshll.u32 %s164_s11, 3 }
  0x25   : > { %s392_s25 = sshll.u32 %s624_s16, 7  ;;  %s168_s30 = scalar_lea.vmem [#allocation2], %s391_s18 }
  0x26   : > { %s753_s19 = scalar_select %p39_p11, %s616_s14, %s41_s7  }
  0x27   : > { %s174_s29 = scalar_lea.hbm %s839_s0, %s392_s25  ;;  %s176_s4 = sshll.u32 %s168_s30, 4  ;;  %s177_s4 = int_to_ptr.vmem [resolvable:$true] %s176_s4 }
  0x28   : > { %p761_p2 = pnand %p433_p0, %p738_p12  ;;  %s165_s5 = scalar_lea.sflag [#allocation3], %s164_s11 }
  0x29   : > { %s529_s6 = scalar_lea.vmem %s177_s4, 128  ;;  %s633_s7 = smov [#allocation2]  }
  0x2a   : > { %p518_p3 = pneg %p761_p2  ;;  %p530_p5 = scmp.ne.s32.totalorder %s177_s4, %s529_s6 }
  0x2b   : > { %s534_s10 = sshll.u32 %s633_s7, 4  ;;  %s535_s10 = int_to_ptr.vmem [resolvable:$false] %s534_s10 }
  0x2c   : > { %p532_p7 = pnand %p530_p5, %p518_p3  ;;  %s536_s25 = scalar_lea.vmem %s535_s10, 256 }
  0x2d   : > { %p537_p4 = scmp.lt.s32.totalorder %s177_s4, %s535_s10  ;;  %p538_p9 = scmp.lt.s32.totalorder %s536_s25, %s529_s6 }
  0x2e   : > { %p533_p6 = pneg %p532_p7 }
  0x2f   : > { %p539_p11 = por %p538_p9, %p537_p4 }
  0x31   : > { %p540_p10 = pnand %p539_p11, %p533_p6 }
  0x33   : > { %543 = shalt.err (!%p540_p10)
}
  0x34   : > { %427 = dma.hbm_to_vmem [thread:$0]  (!%p761_p2), %s174_s29, 128, %s177_s4, %s165_s5  }
  0x35   : > { %185 = sbr.rel (%p711_p8) target bundleno = 275 (0x113), region = 32  ;;  %s772_s8 = sand.u32 (!%p711_p8), 1, %s612_s13  }
  0x36   : > { %s394_s11 = sshll.u32 (!%p711_p8), %s772_s8, 3  ;;  %s188_s18 = scalar_lea.sflag (!%p711_p8), [#allocation3], %s772_s8 }
  0x37   : > { %s191_s26 = scalar_lea.vmem (!%p711_p8), [#allocation2], %s394_s11  ;;  %p853_p12 = scmp.ne.s32.totalorder (!%p711_p8), %s846_s22, 0 }
  0x3a   : > { %595 = dma.done.wait (%p853_p12), %s188_s18, 128  }
  0x3b   : > { %597 = vsyncadd (%p853_p12), %s188_s18, 4294967168 }
  0x3c   : > { %599 = dma.done.wait (%p691_p1), [#allocation6], 128  }
  0x3d   : > { %601 = vsyncadd (%p691_p1), [#allocation6], 4294967168  ;;  %v634_v0 = vmov 0.0   ;;  %vm635_vm0 = vmmov 0   ;;  %v489_v1 = vld [vmem:[#allocation5] sm:$0xff]   ;;  %v219_v2 = vld [vmem:[%s191_s26] sm:$0xff] }
  0x3e   : > { %406 = vmatprep.subr.bf16.mxu0 %v634_v0  ;;  %408 = vmatprep.mubr.msk.bf16.mxu0 %vm635_vm0, %v634_v0  ;;  %v220_v3 = vpack.c.bf16 %v219_v2, %v219_v2  ;;  %vm236_vm1 = vcmask 130048   ;;  %v397_v4 = vld [vmem:[%s841_s2] ss:$0 sm:$0xff]  ;;  %s401_s27 = sshll.u32 %s620_s15, 7  ;;  %s217_s20 = scalar_lea.vmem [#allocation7], %s394_s11 }
  0x3f   : > { %407 = vmatpush3.bf16.msra.mxu0 %v489_v1  ;;  %s296_s29 = sshll.u32 %s217_s20, 4  ;;  %s791_s21 = scalar_lea.hbm %s842_s3, %s401_s27  ;;  %s793_s29 = int_to_ptr.vmem [resolvable:$true] %s296_s29 }
  0x40   : > { %s282_s5 = scalar_lea.sflag [#allocation4], %s772_s8  ;;  %s544_s6 = scalar_lea.vmem %s793_s29, 128 }
  0x41   : > { %p545_p1 = scmp.ne.s32.totalorder %s793_s29, %s544_s6  ;;  %s636_s15 = smov [#allocation7]  }
  0x42   : > { %409 = vmatmul.mubr.msk.bf16.vlgmr.msra.gmra.mxu0 %vm236_vm1, %v220_v3  ;;  %s548_s7 = sshll.u32 %s636_s15, 4  ;;  %s549_s7 = int_to_ptr.vmem [resolvable:$false] %s548_s7 }
  0x43   : > { %p546_p8 = pnand %p545_p1, %p744_p13  ;;  %s550_s10 = scalar_lea.vmem %s549_s7, 256 }
  0x44   : > { %p551_p0 = scmp.lt.s32.totalorder %s793_s29, %s549_s7  ;;  %p552_p2 = scmp.lt.s32.totalorder %s550_s10, %s544_s6 }
  0x45   : > { %p547_p10 = pneg %p546_p8 }
  0x46   : > { %p553_p3 = por %p552_p2, %p551_p0 }
  0x48   : > { %p554_p5 = pnand %p553_p3, %p547_p10 }
 0x102   : > { %v274_v5 = vpop.f32.mrf.mxu0 }
 0x103   : > { %v275_v6 = vadd.f32 %v397_v4, %v274_v5 }
 0x104   : > { %v410_v7 = vpop.f32.mrf.mxu0 }
 0x105   : > { %280 = vst [vmem:[%s217_s20] sm:$0xff] %v275_v6 }
 0x106   : > { %v277_v8 = vpop.f32.mrf.mxu0 }
 0x107   : > { %557 = shalt.err (!%p554_p5)
}
 0x108   : > { %s558_s25 = scalar_lea.hbm %s791_s21, 128  ;;  %s562_s18 = scalar_lea.hbm %s842_s3, 256 }
 0x109   : > { %p559_p7 = scmp.ne.s32.totalorder %s791_s21, %s558_s25  ;;  %p563_p9 = scmp.lt.s32.totalorder %s791_s21, %s842_s3 }
 0x10a   : > { %p564_p11 = scmp.lt.s32.totalorder %s562_s18, %s558_s25 }
 0x10b   : > { %p560_p6 = pnand %p559_p7, %p744_p13 }
 0x10c   : > { %p565_p12 = por %p564_p11, %p563_p9 }
 0x10d   : > { %p561_p4 = pneg %p560_p6 }
 0x10f   : > { %p566_p1 = pnand %p565_p12, %p561_p4 }
 0x111   : > { %569 = shalt.err (!%p566_p1)
}
 0x112   : > { %418 = dma.vmem_to_hbm [thread:$0]  (%p744_p13), %s793_s29, 128, %s791_s21, %s282_s5   ;;  %v411_v9 = vpop.f32.mrf.mxu0 }
 0x113 PF: > { %s308_s24 = sand.u32 1, %s608_s12   ;;  %p854_p8 = scmp.ne.s32.totalorder %s847_s23, 0 }
 0x114   : > { %p855_p10 = scmp.ge.s32.totalorder %s628_s17, 2  ;;  %s309_s27 = scalar_lea.sflag [#allocation4], %s308_s24 }
 0x116   : > { %p429_p0 = pnand %p855_p10, %p854_p8 }
 0x118   : > { %p430_p2 = pneg %p429_p0 }
 0x11a   : > { %603 = dma.done.wait (%p430_p2), %s309_s27, 128  }
 0x11b   : > { %605 = vsyncadd (%p430_p2), %s309_s27, 4294967168  ;;  %s20_s17 = sadd.s32 1, %s628_s17   ;;  %s856_s12 = smov %s612_s13 }
 0x11c   : > { %p17_p3 = scmp.ge.s32.totalorder %s20_s17, 4   ;;  %s857_s13 = smov %s616_s14 }
 0x11d   : > { %s858_s14 = smov %s753_s19  ;;  %s859_s15 = smov %s624_s16 }
 0x11e   : > { %s860_s16 = smov %s862_s28  ;;  %19 = sbr.rel (!%p17_p3) target bundleno = 7 (0x7), region = 81 }
 0x123   :  { %314 = vsyncpa [#allocation3], 1 }
 0x124   :  { %316 = vsyncpa [#allocation3 + $0x1], 1 }
 0x125   :  { %317 = vsyncpa [#allocation6], 1 }
 0x126   :  { %318 = vsyncpa [#allocation4], 1 }
 0x127   :  { %320 = vsyncpa [#allocation4 + $0x1], 1 }

</bundles_post_ra>
